<compile_context>
chip_gen: v5e
topology: v5e:2x2
jax: 0.10.0
libtpu: 0.0.40
codegen_flags: <defaults>
</compile_context>

<pallas_src>
import functools

import jax
import jax.numpy as jnp
from jax import lax
from jax.experimental import pallas as pl
from jax.experimental.pallas import tpu as pltpu

_LANES = 128
_SUBLANES = 8
_CHUNK_ROWS = 64  # (64, 128) f32 = 8 vregs per stream -> bounded vreg pressure


def _round_up(x: int, m: int) -> int:
    return (x + m - 1) // m * m


def _cdiv(a: int, b: int) -> int:
    return -(-a // b)


def _target_block_rows() -> int:
    """Per-generation streaming block height (rows of 128 lanes)."""
    try:
        kind = jax.devices()[0].device_kind.lower()
    except Exception:
        return 4096
    if "v5 lite" in kind or "v5e" in kind or "v5lite" in kind:
        return 4096  # keep 2 inputs x 2 buffers comfortably inside v5e VMEM
    return 8192      # v6e / v7x: 4 MiB (f32) per input per buffer


def _is_multi_tensorcore() -> bool:
    """True on chips exposing 2 TensorCores behind one device (v4/v5p/v7x)."""
    try:
        kind = jax.devices()[0].device_kind.lower()
    except Exception:
        return False
    return any(tag in kind for tag in ("v4", "v5p", "v7", "7x"))


def _mcc_partial_kernel(yp_ref, yt_ref, out_ref, tp_acc, p_acc, t_acc, *,
                        threshold: float, block_rows: int, chunk: int,
                        full_chunks: int, rem_rows: int,
                        full_valid_rows: int, rem_lanes: int):
    s = pl.program_id(1)

    @pl.when(s == 0)
    def _init():
        tp_acc[...] = jnp.zeros_like(tp_acc)
        p_acc[...] = jnp.zeros_like(p_acc)
        t_acc[...] = jnp.zeros_like(t_acc)

    # Global row offset of this block (grid is (ncores, steps)).
    base_row = (pl.program_id(0) * pl.num_programs(1) + s) * block_rows

    def accum(row0, size, masked):
        ypv = yp_ref[pl.ds(row0, size), :].astype(jnp.float32)
        ytv = yt_ref[pl.ds(row0, size), :].astype(jnp.float32)
        yp = (ypv >= threshold).astype(jnp.float32)
        if masked:
            gr = base_row + row0 + lax.broadcasted_iota(
                jnp.int32, (size, _LANES), 0)
            lane = lax.broadcasted_iota(jnp.int32, (size, _LANES), 1)
            valid = (gr < full_valid_rows) | (
                (gr == full_valid_rows) & (lane < rem_lanes))
            yp = jnp.where(valid, yp, 0.0)
            ytv = jnp.where(valid, ytv, 0.0)
        # Per-(sublane, lane) partial sums on the VPU; the reshape only splits
        # the sublane dim into vreg-aligned groups of 8 (layout-free).
        tp_acc[...] += jnp.sum((yp * ytv).reshape(-1, _SUBLANES, _LANES), axis=0)
        p_acc[...] += jnp.sum(yp.reshape(-1, _SUBLANES, _LANES), axis=0)
        t_acc[...] += jnp.sum(ytv.reshape(-1, _SUBLANES, _LANES), axis=0)

    def run_block(masked):
        if full_chunks > 1:
            def body(i, carry):
                accum(pl.multiple_of(i * chunk, chunk), chunk, masked)
                return carry
            lax.fori_loop(0, full_chunks, body, 0,
                          unroll=8 if full_chunks >= 8 else True)
        else:
            accum(0, chunk, masked)
        if rem_rows:
            accum(full_chunks * chunk, rem_rows, masked)

    # Unmasked fast path for blocks that lie entirely inside the valid data.
    block_is_full = (base_row + block_rows) <= full_valid_rows

    @pl.when(block_is_full)
    def _fast():
        run_block(masked=False)

    @pl.when(jnp.logical_not(block_is_full))
    def _tail():
        run_block(masked=True)

    # One-time writeback of the (8,128) partials; cross-lane reduction and the
    # tiny scalar epilogue happen in the wrapper.
    @pl.when(s == pl.num_programs(1) - 1)
    def _finalize():
        out_ref[0, 0] = tp_acc[...]
        out_ref[0, 1] = p_acc[...]
        out_ref[0, 2] = t_acc[...]


def mcc_loss(y_pred: jax.Array, y_true: jax.Array,
             eps: float = 1e-5, threshold: float = 0.5) -> jax.Array:
    """Pallas-backed MCC loss. Returns a scalar f32 (1 - MCC)."""
    yp_flat = y_pred.reshape(-1)   # native dtype, no astype copy
    yt_flat = y_true.reshape(-1)
    n = int(yp_flat.shape[0])

    # Align the flat length to one vreg (8*128) so the (rows, 128) reshape is
    # legal; this pad is < 1024 elements and skipped entirely for the common
    # lane-aligned case. Pad values are irrelevant (masked in-kernel).
    n_aligned = _round_up(max(n, 1), _SUBLANES * _LANES)
    if n_aligned != n:
        # TODO(synk): this tiny alignment pad still copies the arrays; callers
        # with n % 1024 == 0 (typical segmentation maps) never hit it.
        yp_flat = jnp.pad(yp_flat, (0, n_aligned - n))
        yt_flat = jnp.pad(yt_flat, (0, n_aligned - n))

    rows = n_aligned // _LANES
    yp2 = yp_flat.reshape(rows, _LANES)
    yt2 = yt_flat.reshape(rows, _LANES)

    block_rows = min(_target_block_rows(), rows)         # multiple of 8
    total_blocks = _cdiv(rows, block_rows)
    ncores = 2 if (_is_multi_tensorcore()
                   and total_blocks >= 2
                   and total_blocks % 2 == 0) else 1
    steps = total_blocks // ncores

    chunk = min(_CHUNK_ROWS, block_rows)
    full_chunks = block_rows // chunk
    rem_rows = block_rows % chunk

    kernel = functools.partial(
        _mcc_partial_kernel,
        threshold=float(threshold),
        block_rows=block_rows,
        chunk=chunk,
        full_chunks=full_chunks,
        rem_rows=rem_rows,
        full_valid_rows=n // _LANES,
        rem_lanes=n % _LANES,
    )

    in_map = lambda c, s, _steps=steps: (c * _steps + s, 0)
    in_block_bytes = block_rows * _LANES * (yp2.dtype.itemsize +
                                            yt2.dtype.itemsize)
    vmem_limit = int(min(max(2 * in_block_bytes + (8 << 20), 16 << 20),
                         64 << 20))

    parts = pl.pallas_call(
        kernel,
        out_shape=jax.ShapeDtypeStruct((ncores, 3, _SUBLANES, _LANES),
                                       jnp.float32),
        grid=(ncores, steps),
        in_specs=[
            pl.BlockSpec((block_rows, _LANES), in_map),
            pl.BlockSpec((block_rows, _LANES), in_map),
        ],
        out_specs=pl.BlockSpec((1, 3, _SUBLANES, _LANES),
                               lambda c, s: (c, 0, 0, 0)),
        scratch_shapes=[pltpu.VMEM((_SUBLANES, _LANES), jnp.float32)] * 3,
        compiler_params=pltpu.CompilerParams(
            dimension_semantics=("parallel", "arbitrary"),
            vmem_limit_bytes=vmem_limit),
        cost_estimate=pl.CostEstimate(
            flops=6 * n_aligned,
            transcendentals=0,
            bytes_accessed=n_aligned * (yp2.dtype.itemsize +
                                        yt2.dtype.itemsize)),
    )(yp2, yt2)

    # Combine per-core / per-lane partials and do the tiny scalar epilogue
    # (eps / sqrt / divide) on a handful of floats in plain JAX.
    # Note: f32 sums (and tn derived from n) match the f32 PyTorch reference;
    # exact integer counting is lost above ~2^24 valid elements.
    s_tp = jnp.sum(parts[:, 0])
    s_p = jnp.sum(parts[:, 1])
    s_t = jnp.sum(parts[:, 2])

    tp = s_tp + eps
    fp = (s_p - s_tp) + eps
    fn = (s_t - s_tp) + eps
    tn = (jnp.float32(n) - s_p - s_t + s_tp) + eps

    numerator = tp * tn - fp * fn
    denominator = jnp.sqrt((tp + fp) * (tp + fn) * (tn + fp) * (tn + fn))
    return (1.0 - numerator / denominator).astype(jnp.float32)


def _mcc_loss_ref(y_pred, y_true, eps=1e-5, threshold=0.5):
    """Pure-JAX reference mirroring the PyTorch forward."""
    yp = (y_pred >= threshold).astype(jnp.float32).reshape(-1)
    yt = y_true.astype(jnp.float32).reshape(-1)
    tp = jnp.sum(yp * yt) + eps
    tn = jnp.sum((1 - yp) * (1 - yt)) + eps
    fp = jnp.sum(yp * (1 - yt)) + eps
    fn = jnp.sum((1 - yp) * yt) + eps
    num = tp * tn - fp * fn
    den = jnp.sqrt((tp + fp) * (tp + fn) * (tn + fp) * (tn + fn))
    return 1.0 - num / den


if __name__ == "__main__":
    key = jax.random.PRNGKey(0)
    k1, k2 = jax.random.split(key)

    # y_pred: model probabilities in [0, 1); y_true: binary ground truth.
    y_pred = jax.random.uniform(k1, (2, 1, 16, 16), dtype=jnp.float32)
    y_true = (jax.random.uniform(k2, (2, 1, 16, 16), dtype=jnp.float32) > 0.5
              ).astype(jnp.float32)

    loss = jax.block_until_ready(mcc_loss(y_pred, y_true))
    ref = jax.block_until_ready(_mcc_loss_ref(y_pred, y_true))
    assert jnp.allclose(loss, ref, atol=1e-5, rtol=1e-5), (loss, ref)

    print("KERNEL_OK")
</pallas_src>

<mosaic_0001>
module attributes {stable_mosaic.version = 11 : i64} {
  func.func @_mcc_partial_kernel(%arg0: i32, %arg1: i32, %arg2: memref<8x128xf32, #tpu.memory_space<vmem>>, %arg3: memref<8x128xf32, #tpu.memory_space<vmem>>, %arg4: memref<1x3x8x128xf32, #tpu.memory_space<vmem>>, %arg5: memref<8x128xf32, #tpu.memory_space<vmem>>, %arg6: memref<8x128xf32, #tpu.memory_space<vmem>>, %arg7: memref<8x128xf32, #tpu.memory_space<vmem>>) attributes {dimension_semantics = [#tpu.dimension_semantics<parallel>, #tpu.dimension_semantics<arbitrary>], iteration_bounds = array<i64: 1, 1>, scalar_prefetch = 0 : i64, scratch_operands = 3 : i64, tpu.core_type = #tpu.core_type<tc>, window_params = [{transform_indices = @transform_0, window_bounds = array<i64: 8, 128>}, {transform_indices = @transform_1, window_bounds = array<i64: 8, 128>}, {transform_indices = @transform_2, window_bounds = array<i64: 1, 3, 8, 128>}]} {
    %c0_i32 = arith.constant 0 : i32
    %0 = arith.cmpi eq, %arg1, %c0_i32 : i32
    %1 = arith.extui %0 : i1 to i32
    %c0_i32_0 = arith.constant 0 : i32
    %2 = arith.cmpi ne, %1, %c0_i32_0 : i32
    scf.if %2 {
      %cst = arith.constant 0.000000e+00 : f32
      %16 = vector.broadcast %cst : f32 to vector<8x128xf32>
      %c0 = arith.constant 0 : index
      %c0_6 = arith.constant 0 : index
      %17 = vector.load %arg5[%c0, %c0_6] : memref<8x128xf32, #tpu.memory_space<vmem>>, vector<8x128xf32>
      tpu.vector_store %arg5[%c0, %c0_6], %16 {strides = array<i32>} : memref<8x128xf32, #tpu.memory_space<vmem>>, vector<8x128xf32>,
      %cst_7 = arith.constant 0.000000e+00 : f32
      %18 = vector.broadcast %cst_7 : f32 to vector<8x128xf32>
      %c0_8 = arith.constant 0 : index
      %c0_9 = arith.constant 0 : index
      %19 = vector.load %arg6[%c0_8, %c0_9] : memref<8x128xf32, #tpu.memory_space<vmem>>, vector<8x128xf32>
      tpu.vector_store %arg6[%c0_8, %c0_9], %18 {strides = array<i32>} : memref<8x128xf32, #tpu.memory_space<vmem>>, vector<8x128xf32>,
      %cst_10 = arith.constant 0.000000e+00 : f32
      %20 = vector.broadcast %cst_10 : f32 to vector<8x128xf32>
      %c0_11 = arith.constant 0 : index
      %c0_12 = arith.constant 0 : index
      %21 = vector.load %arg7[%c0_11, %c0_12] : memref<8x128xf32, #tpu.memory_space<vmem>>, vector<8x128xf32>
      tpu.vector_store %arg7[%c0_11, %c0_12], %20 {strides = array<i32>} : memref<8x128xf32, #tpu.memory_space<vmem>>, vector<8x128xf32>,
    } else {
    }
    %c1_i32 = arith.constant 1 : i32
    %3 = arith.muli %arg0, %c1_i32 : i32
    %4 = arith.addi %3, %arg1 : i32
    %c8_i32 = arith.constant 8 : i32
    %5 = arith.muli %4, %c8_i32 : i32
    %c8_i32_1 = arith.constant 8 : i32
    %6 = arith.addi %5, %c8_i32_1 : i32
    %c4_i32 = arith.constant 4 : i32
    %7 = arith.cmpi sle, %6, %c4_i32 : i32
    %8 = arith.extui %7 : i1 to i32
    %c0_i32_2 = arith.constant 0 : i32
    %9 = arith.cmpi ne, %8, %c0_i32_2 : i32
    scf.if %9 {
      %c0 = arith.constant 0 : index
      %c0_6 = arith.constant 0 : index
      %16 = vector.load %arg2[%c0, %c0_6] : memref<8x128xf32, #tpu.memory_space<vmem>>, vector<8x128xf32>
      %c0_7 = arith.constant 0 : index
      %c0_8 = arith.constant 0 : index
      %17 = vector.load %arg3[%c0_7, %c0_8] : memref<8x128xf32, #tpu.memory_space<vmem>>, vector<8x128xf32>
      %cst = arith.constant 5.000000e-01 : f32
      %18 = vector.broadcast %cst : f32 to vector<8x128xf32>
      %19 = arith.cmpf oge, %16, %18 : vector<8x128xf32>
      %20 = arith.extui %19 : vector<8x128xi1> to vector<8x128xi32>
      %21 = arith.sitofp %20 : vector<8x128xi32> to vector<8x128xf32>
      %c0_9 = arith.constant 0 : index
      %c0_10 = arith.constant 0 : index
      %22 = vector.load %arg5[%c0_9, %c0_10] : memref<8x128xf32, #tpu.memory_space<vmem>>, vector<8x128xf32>
      %23 = arith.mulf %21, %17 : vector<8x128xf32>
      %24 = vector.shape_cast %23 : vector<8x128xf32> to vector<1x8x128xf32>
      %cst_11 = arith.constant dense<0.000000e+00> : vector<8x128xf32>
      %25 = vector.multi_reduction <add>, %24, %cst_11 [0] : vector<1x8x128xf32> to vector<8x128xf32>
      %26 = arith.addf %22, %25 : vector<8x128xf32>
      %c0_12 = arith.constant 0 : index
      %c0_13 = arith.constant 0 : index
      %27 = vector.load %arg5[%c0_12, %c0_13] : memref<8x128xf32, #tpu.memory_space<vmem>>, vector<8x128xf32>
      tpu.vector_store %arg5[%c0_12, %c0_13], %26 {strides = array<i32>} : memref<8x128xf32, #tpu.memory_space<vmem>>, vector<8x128xf32>,
      %c0_14 = arith.constant 0 : index
      %c0_15 = arith.constant 0 : index
      %28 = vector.load %arg6[%c0_14, %c0_15] : memref<8x128xf32, #tpu.memory_space<vmem>>, vector<8x128xf32>
      %29 = vector.shape_cast %21 : vector<8x128xf32> to vector<1x8x128xf32>
      %cst_16 = arith.constant dense<0.000000e+00> : vector<8x128xf32>
      %30 = vector.multi_reduction <add>, %29, %cst_16 [0] : vector<1x8x128xf32> to vector<8x128xf32>
      %31 = arith.addf %28, %30 : vector<8x128xf32>
      %c0_17 = arith.constant 0 : index
      %c0_18 = arith.constant 0 : index
      %32 = vector.load %arg6[%c0_17, %c0_18] : memref<8x128xf32, #tpu.memory_space<vmem>>, vector<8x128xf32>
      tpu.vector_store %arg6[%c0_17, %c0_18], %31 {strides = array<i32>} : memref<8x128xf32, #tpu.memory_space<vmem>>, vector<8x128xf32>,
      %c0_19 = arith.constant 0 : index
      %c0_20 = arith.constant 0 : index
      %33 = vector.load %arg7[%c0_19, %c0_20] : memref<8x128xf32, #tpu.memory_space<vmem>>, vector<8x128xf32>
      %34 = vector.shape_cast %17 : vector<8x128xf32> to vector<1x8x128xf32>
      %cst_21 = arith.constant dense<0.000000e+00> : vector<8x128xf32>
      %35 = vector.multi_reduction <add>, %34, %cst_21 [0] : vector<1x8x128xf32> to vector<8x128xf32>
      %36 = arith.addf %33, %35 : vector<8x128xf32>
      %c0_22 = arith.constant 0 : index
      %c0_23 = arith.constant 0 : index
      %37 = vector.load %arg7[%c0_22, %c0_23] : memref<8x128xf32, #tpu.memory_space<vmem>>, vector<8x128xf32>
      tpu.vector_store %arg7[%c0_22, %c0_23], %36 {strides = array<i32>} : memref<8x128xf32, #tpu.memory_space<vmem>>, vector<8x128xf32>,
    } else {
    }
    %true = arith.constant true
    %10 = arith.xori %7, %true : i1
    %11 = arith.extui %10 : i1 to i32
    %c0_i32_3 = arith.constant 0 : i32
    %12 = arith.cmpi ne, %11, %c0_i32_3 : i32
    scf.if %12 {
      %c0 = arith.constant 0 : index
      %c0_6 = arith.constant 0 : index
      %16 = vector.load %arg2[%c0, %c0_6] : memref<8x128xf32, #tpu.memory_space<vmem>>, vector<8x128xf32>
      %c0_7 = arith.constant 0 : index
      %c0_8 = arith.constant 0 : index
      %17 = vector.load %arg3[%c0_7, %c0_8] : memref<8x128xf32, #tpu.memory_space<vmem>>, vector<8x128xf32>
      %cst = arith.constant 5.000000e-01 : f32
      %18 = vector.broadcast %cst : f32 to vector<8x128xf32>
      %19 = arith.cmpf oge, %16, %18 : vector<8x128xf32>
      %20 = arith.extui %19 : vector<8x128xi1> to vector<8x128xi32>
      %21 = arith.sitofp %20 : vector<8x128xi32> to vector<8x128xf32>
      %c0_i32_9 = arith.constant 0 : i32
      %22 = arith.addi %5, %c0_i32_9 : i32
      %23 = tpu.iota {dimensions = array<i32: 0>} : vector<8x128xi32>
      %24 = vector.broadcast %22 : i32 to vector<8x128xi32>
      %25 = arith.addi %24, %23 : vector<8x128xi32>
      %26 = tpu.iota {dimensions = array<i32: 1>} : vector<8x128xi32>
      %c4_i32_10 = arith.constant 4 : i32
      %27 = vector.broadcast %c4_i32_10 : i32 to vector<8x128xi32>
      %28 = arith.cmpi slt, %25, %27 : vector<8x128xi32>
      %c4_i32_11 = arith.constant 4 : i32
      %29 = vector.broadcast %c4_i32_11 : i32 to vector<8x128xi32>
      %30 = arith.cmpi eq, %25, %29 : vector<8x128xi32>
      %c0_i32_12 = arith.constant 0 : i32
      %31 = vector.broadcast %c0_i32_12 : i32 to vector<8x128xi32>
      %32 = arith.cmpi slt, %26, %31 : vector<8x128xi32>
      %33 = arith.andi %30, %32 : vector<8x128xi1>
      %34 = arith.ori %28, %33 : vector<8x128xi1>
      %cst_13 = arith.constant 0.000000e+00 : f32
      %35 = vector.broadcast %cst_13 : f32 to vector<8x128xf32>
      %36 = arith.select %34, %21, %35 : vector<8x128xi1>, vector<8x128xf32>
      %cst_14 = arith.constant 0.000000e+00 : f32
      %37 = vector.broadcast %cst_14 : f32 to vector<8x128xf32>
      %38 = arith.select %34, %17, %37 : vector<8x128xi1>, vector<8x128xf32>
      %c0_15 = arith.constant 0 : index
      %c0_16 = arith.constant 0 : index
      %39 = vector.load %arg5[%c0_15, %c0_16] : memref<8x128xf32, #tpu.memory_space<vmem>>, vector<8x128xf32>
      %40 = arith.mulf %36, %38 : vector<8x128xf32>
      %41 = vector.shape_cast %40 : vector<8x128xf32> to vector<1x8x128xf32>
      %cst_17 = arith.constant dense<0.000000e+00> : vector<8x128xf32>
      %42 = vector.multi_reduction <add>, %41, %cst_17 [0] : vector<1x8x128xf32> to vector<8x128xf32>
      %43 = arith.addf %39, %42 : vector<8x128xf32>
      %c0_18 = arith.constant 0 : index
      %c0_19 = arith.constant 0 : index
      %44 = vector.load %arg5[%c0_18, %c0_19] : memref<8x128xf32, #tpu.memory_space<vmem>>, vector<8x128xf32>
      tpu.vector_store %arg5[%c0_18, %c0_19], %43 {strides = array<i32>} : memref<8x128xf32, #tpu.memory_space<vmem>>, vector<8x128xf32>,
      %c0_20 = arith.constant 0 : index
      %c0_21 = arith.constant 0 : index
      %45 = vector.load %arg6[%c0_20, %c0_21] : memref<8x128xf32, #tpu.memory_space<vmem>>, vector<8x128xf32>
      %46 = vector.shape_cast %36 : vector<8x128xf32> to vector<1x8x128xf32>
      %cst_22 = arith.constant dense<0.000000e+00> : vector<8x128xf32>
      %47 = vector.multi_reduction <add>, %46, %cst_22 [0] : vector<1x8x128xf32> to vector<8x128xf32>
      %48 = arith.addf %45, %47 : vector<8x128xf32>
      %c0_23 = arith.constant 0 : index
      %c0_24 = arith.constant 0 : index
      %49 = vector.load %arg6[%c0_23, %c0_24] : memref<8x128xf32, #tpu.memory_space<vmem>>, vector<8x128xf32>
      tpu.vector_store %arg6[%c0_23, %c0_24], %48 {strides = array<i32>} : memref<8x128xf32, #tpu.memory_space<vmem>>, vector<8x128xf32>,
      %c0_25 = arith.constant 0 : index
      %c0_26 = arith.constant 0 : index
      %50 = vector.load %arg7[%c0_25, %c0_26] : memref<8x128xf32, #tpu.memory_space<vmem>>, vector<8x128xf32>
      %51 = vector.shape_cast %38 : vector<8x128xf32> to vector<1x8x128xf32>
      %cst_27 = arith.constant dense<0.000000e+00> : vector<8x128xf32>
      %52 = vector.multi_reduction <add>, %51, %cst_27 [0] : vector<1x8x128xf32> to vector<8x128xf32>
      %53 = arith.addf %50, %52 : vector<8x128xf32>
      %c0_28 = arith.constant 0 : index
      %c0_29 = arith.constant 0 : index
      %54 = vector.load %arg7[%c0_28, %c0_29] : memref<8x128xf32, #tpu.memory_space<vmem>>, vector<8x128xf32>
      tpu.vector_store %arg7[%c0_28, %c0_29], %53 {strides = array<i32>} : memref<8x128xf32, #tpu.memory_space<vmem>>, vector<8x128xf32>,
    } else {
    }
    %c0_i32_4 = arith.constant 0 : i32
    %13 = arith.cmpi eq, %arg1, %c0_i32_4 : i32
    %14 = arith.extui %13 : i1 to i32
    %c0_i32_5 = arith.constant 0 : i32
    %15 = arith.cmpi ne, %14, %c0_i32_5 : i32
    scf.if %15 {
      %c0 = arith.constant 0 : index
      %c0_6 = arith.constant 0 : index
      %16 = vector.load %arg5[%c0, %c0_6] : memref<8x128xf32, #tpu.memory_space<vmem>>, vector<8x128xf32>
      %c0_7 = arith.constant 0 : index
      %c0_8 = arith.constant 0 : index
      %c0_9 = arith.constant 0 : index
      %c0_10 = arith.constant 0 : index
      %17 = vector.load %arg4[%c0_7, %c0_8, %c0_9, %c0_10] : memref<1x3x8x128xf32, #tpu.memory_space<vmem>>, vector<1x1x8x128xf32>
      %18 = vector.shape_cast %17 : vector<1x1x8x128xf32> to vector<8x128xf32>
      %19 = vector.shape_cast %16 : vector<8x128xf32> to vector<1x1x8x128xf32>
      tpu.vector_store %arg4[%c0_7, %c0_8, %c0_9, %c0_10], %19 {strides = array<i32>} : memref<1x3x8x128xf32, #tpu.memory_space<vmem>>, vector<1x1x8x128xf32>,
      %c0_11 = arith.constant 0 : index
      %c0_12 = arith.constant 0 : index
      %20 = vector.load %arg6[%c0_11, %c0_12] : memref<8x128xf32, #tpu.memory_space<vmem>>, vector<8x128xf32>
      %c0_13 = arith.constant 0 : index
      %c1 = arith.constant 1 : index
      %c0_14 = arith.constant 0 : index
      %c0_15 = arith.constant 0 : index
      %21 = vector.load %arg4[%c0_13, %c1, %c0_14, %c0_15] : memref<1x3x8x128xf32, #tpu.memory_space<vmem>>, vector<1x1x8x128xf32>
      %22 = vector.shape_cast %21 : vector<1x1x8x128xf32> to vector<8x128xf32>
      %23 = vector.shape_cast %20 : vector<8x128xf32> to vector<1x1x8x128xf32>
      tpu.vector_store %arg4[%c0_13, %c1, %c0_14, %c0_15], %23 {strides = array<i32>} : memref<1x3x8x128xf32, #tpu.memory_space<vmem>>, vector<1x1x8x128xf32>,
      %c0_16 = arith.constant 0 : index
      %c0_17 = arith.constant 0 : index
      %24 = vector.load %arg7[%c0_16, %c0_17] : memref<8x128xf32, #tpu.memory_space<vmem>>, vector<8x128xf32>
      %c0_18 = arith.constant 0 : index
      %c2 = arith.constant 2 : index
      %c0_19 = arith.constant 0 : index
      %c0_20 = arith.constant 0 : index
      %25 = vector.load %arg4[%c0_18, %c2, %c0_19, %c0_20] : memref<1x3x8x128xf32, #tpu.memory_space<vmem>>, vector<1x1x8x128xf32>
      %26 = vector.shape_cast %25 : vector<1x1x8x128xf32> to vector<8x128xf32>
      %27 = vector.shape_cast %24 : vector<8x128xf32> to vector<1x1x8x128xf32>
      tpu.vector_store %arg4[%c0_18, %c2, %c0_19, %c0_20], %27 {strides = array<i32>} : memref<1x3x8x128xf32, #tpu.memory_space<vmem>>, vector<1x1x8x128xf32>,
    } else {
    }
    return
  }
  func.func @transform_0(%arg0: i32, %arg1: i32) -> (i32, i32) {
    %c1_i32 = arith.constant 1 : i32
    %0 = arith.muli %arg0, %c1_i32 : i32
    %1 = arith.addi %0, %arg1 : i32
    %c0_i32 = arith.constant 0 : i32
    %c0_i32_0 = arith.constant 0 : i32
    return %1, %c0_i32 : i32, i32
  }
  func.func @transform_1(%arg0: i32, %arg1: i32) -> (i32, i32) {
    %c1_i32 = arith.constant 1 : i32
    %0 = arith.muli %arg0, %c1_i32 : i32
    %1 = arith.addi %0, %arg1 : i32
    %c0_i32 = arith.constant 0 : i32
    %c0_i32_0 = arith.constant 0 : i32
    return %1, %c0_i32 : i32, i32
  }
  func.func @transform_2(%arg0: i32, %arg1: i32) -> (i32, i32, i32, i32) {
    %c0_i32 = arith.constant 0 : i32
    %c0_i32_0 = arith.constant 0 : i32
    %c0_i32_1 = arith.constant 0 : i32
    %c0_i32_2 = arith.constant 0 : i32
    return %arg0, %c0_i32, %c0_i32_0, %c0_i32_1 : i32, i32, i32, i32
  }
}

</mosaic_0001>

<bundles_post_ra>
// kernel: tpu_custom_call.1
= control target key start
LH: loop header
LB: loop body
LE: loop exit
PB: predicated region body
PF: predicated region fallthrough
CT: control target
= control target key end

     0   :  { %7 = vsyncpa [#allocation6], 0  ;;  %s262_s0 = inlined_call_operand.hbm [shape: f32[8,128], index: 0, kind: input, shape index: {}]   ;;  %s263_s1 = inlined_call_operand.hbm [shape: f32[8,128], index: 1, kind: input, shape index: {}]   ;;  %s264_s2 = inlined_call_operand.hbm [shape: f32[1,3,8,128], index: 2, kind: output, shape index: {}]  }
   0x1   :  { %8 = vsyncpa [#allocation9], 0 }
   0x2   :  { %9 = vsyncpa [#allocation7], 0  ;;  %s18_s11 = sshll.u32 %s262_s0, 4  ;;  %s232_s12 = smov [#allocation5]   ;;  %s19_s11 = int_to_ptr.hbm [resolvable:$true] %s18_s11 }
   0x3   :  { %s20_s13 = sshll.u32 %s232_s12, 4  ;;  %s32_s16 = sshll.u32 %s263_s1, 4  ;;  %s21_s13 = int_to_ptr.vmem [resolvable:$true] %s20_s13  ;;  %s33_s16 = int_to_ptr.hbm [resolvable:$true] %s32_s16 }
   0x4   :  { %23 = dma.hbm_to_vmem [thread:$0]  %s19_s11, 128, %s21_s13, [#allocation6]  }
   0x5   :  { %s233_s17 = smov [#allocation8]  }
   0x6   :  { %s34_s18 = sshll.u32 %s233_s17, 4  ;;  %s35_s18 = int_to_ptr.vmem [resolvable:$true] %s34_s18 }
   0x7   :  { %37 = dma.hbm_to_vmem [thread:$0]  %s33_s16, 128, %s35_s18, [#allocation9]  }
   0x8   :  { %226 = dma.done.wait [#allocation6], 128  }
   0x9   :  { %227 = vsyncadd [#allocation6], 4294967168 }
   0xa   :  { %228 = dma.done.wait [#allocation9], 128  }
   0xb   :  { %229 = vsyncadd [#allocation9], 4294967168  ;;  %v89_v0 = vlaneseq  ;;  %v84_v2 = vld [vmem:[#allocation5] sm:$0xff]  ;;  %v85_v3 = vld [vmem:[#allocation8] sm:$0xff]  ;;  %s234_s0 = smov [#allocation10]   ;;  %s132_s1 = sshll.u32 %s264_s2, 4  ;;  %s133_s1 = int_to_ptr.hbm [resolvable:$true] %s132_s1 }
   0xc   :  { %s130_s19 = sshll.u32 %s234_s0, 4  ;;  %vm86_vm1 = vcmp.ge.f32.partialorder %v84_v2, 0.5  ;;  %v235_v5 = vmov 0.0   ;;  %s236_s22 = smov 128   ;;  %s131_s19 = int_to_ptr.vmem [resolvable:$true] %s130_s19 }
   0xd   :  { %v90_v1 = vshrl.u32 %v89_v0, 7  ;;  %v147_v6 = vsel %vm86_vm1, 1.0, %v235_v5  ;;  %s237_s23 = smov 8  }
   0xf   :  { %vm95_vm0 = vcmp.lt.s32.totalorder %v90_v1, 4 }
  0x10   :  { %v101_v4 = vsel %vm95_vm0, %v85_v3, 0.0  ;;  %v100_v7 = vsel %vm95_vm0, %v147_v6, 0.0 }
  0x11   :  { %125 = vst [vmem:[#allocation10 + $0x10] sm:$0xff] %v101_v4  ;;  %v103_v8 = vmul.f32 %v101_v4, %v100_v7 }
  0x12   :  { %122 = vst [vmem:[#allocation10 + $0x8] sm:$0xff] %v100_v7 }
  0x13   :  { %119 = vst [vmem:[#allocation10] sm:$0xff] %v103_v8 }
  0x14   :  { %138 = dma.vmem_to_hbm [thread:$0]  %s131_s19, 384, %s133_s1, [#allocation7], %s236_s22, %s236_s22, %s237_s23  }
  0x15   :  { %230 = dma.done.wait [#allocation7], 384  }
  0x16   :  { %231 = vsyncadd [#allocation7], 4294966912 }
  0x17   :  { %143 = vsyncpa [#allocation6], 1 }
  0x18   :  { %144 = vsyncpa [#allocation9], 1 }
  0x19   :  { %145 = vsyncpa [#allocation7], 1 }

</bundles_post_ra>
